<compile_context>
chip_gen: v7x
topology: tpu7x:2x2x1
jax: 0.10.0
libtpu: 0.0.40
codegen_flags: <defaults>
</compile_context>

<pallas_src>
import jax
import jax.numpy as jnp
from jax.experimental import pallas as pl


# ---------------------------------------------------------------------------
# Fused Pallas kernel: 2x (mean-agg -> fused lin_l+lin_r+bias [-> relu]) -> log_softmax
# ---------------------------------------------------------------------------

def sage_fused_kernel(a0_ref, a1_ref, x_ref, w0_ref, b0_ref, w1_ref, b1_ref, o_ref):
    m1 = a0_ref.shape[0]   # padded #targets after hop 0 (multiple of 128)
    m2 = a1_ref.shape[0]   # padded #targets after hop 1 (multiple of 16)

    # ---- Layer 0 -----------------------------------------------------------
    x = x_ref[...]                                          # bf16 feats [n_pad, c0]
    # a0 is already row-normalized (mean aggregation baked in host-side).
    agg0 = jnp.dot(a0_ref[...], x, preferred_element_type=jnp.float32)
    # fused lin_l/lin_r: [agg | x_target] @ [W_l ; W_r]   (K = 2*c0, one MXU chain)
    cat0 = jnp.concatenate([agg0.astype(jnp.bfloat16), x[:m1, :]], axis=-1)
    h = jnp.dot(cat0, w0_ref[...], preferred_element_type=jnp.float32)
    h = jnp.maximum(h + b0_ref[...], 0.0)                   # ReLU
    # dropout(p=0.5): eval-mode identity

    # ---- Layer 1 -----------------------------------------------------------
    h16 = h.astype(jnp.bfloat16)
    agg1 = jnp.dot(a1_ref[...], h16, preferred_element_type=jnp.float32)
    cat1 = jnp.concatenate([agg1.astype(jnp.bfloat16), h16[:m2, :]], axis=-1)
    z = jnp.dot(cat1, w1_ref[...], preferred_element_type=jnp.float32)
    # Padded class lanes of b1 are pre-set to -1e30 host-side -> masked log_softmax
    # without any iota/compare/select in-kernel.
    z = z + b1_ref[...]

    # ---- log_softmax --------------------------------------------------------
    m = jnp.max(z, axis=-1, keepdims=True)
    s = z - m
    lse = jnp.log(jnp.sum(jnp.exp(s), axis=-1, keepdims=True))
    o_ref[...] = (s - lse).astype(o_ref.dtype)


# ---------------------------------------------------------------------------
# Host-side glue (padding, normalized dense adjacency via scatter-add)
# ---------------------------------------------------------------------------

def _round_up(v, m):
    return (v + m - 1) // m * m


def _pad2d(a, rows, cols, value=0.0):
    return jnp.pad(a, ((0, rows - a.shape[0]), (0, cols - a.shape[1])),
                   constant_values=value)


def _full_spec(shape):
    # single-tile (grid-less) call: block == full array
    return pl.BlockSpec(shape, lambda: (0,) * len(shape))


def build_norm_adj(edge_index, num_src_pad, num_dst_pad):
    """A[t, s] = #edges(s->t) / deg(t), built in f32 via scatter-add, cast to bf16.

    Normalized weights are <= 1 so the bf16 cast is safe even for large fanouts
    (raw integer counts are never stored in bf16).
    """
    src = edge_index[0]
    dst = edge_index[1]
    counts = jnp.zeros((num_dst_pad, num_src_pad), jnp.float32).at[dst, src].add(1.0)
    deg = jnp.sum(counts, axis=-1, keepdims=True)
    return (counts / jnp.maximum(deg, 1.0)).astype(jnp.bfloat16)


def sage_forward(x, adjs, params):
    """Mirrors SAGE.forward for 2 hops: adjs = [(edge_index, None, (n_src, n_dst)), ...]."""
    (e0, _, (ns0, nd0)), (e1, _, (ns1, nd1)) = adjs
    assert ns1 == nd0 and nd0 <= ns0 and nd1 <= nd0, "NeighborSampler prefix convention"
    (wl0, wr0, b0), (wl1, wr1, b1) = params
    in_c, hid_c, out_c = wl0.shape[0], wl0.shape[1], wl1.shape[1]

    # Padded geometry:
    #   n_pad, m1_pad are lane/K dims of the adjacencies -> multiples of 128,
    #   m2_pad is a bf16 sublane dim only -> multiple of 16,
    #   channel dims -> multiples of 128 (lane-dense loads, unmasked vst on output).
    n_pad = _round_up(ns0, 128)
    m1_pad = _round_up(nd0, 128)
    m2_pad = _round_up(nd1, 16)
    c0 = _round_up(in_c, 128)
    c1 = _round_up(hid_c, 128)
    c2 = _round_up(out_c, 128)

    a0 = build_norm_adj(e0, n_pad, m1_pad)                    # bf16 [m1_pad, n_pad]
    a1 = build_norm_adj(e1, m1_pad, m2_pad)                   # bf16 [m2_pad, m1_pad]
    xp = _pad2d(x, n_pad, c0).astype(jnp.bfloat16)
    w0 = jnp.concatenate([_pad2d(wl0, c0, c1), _pad2d(wr0, c0, c1)],
                         axis=0).astype(jnp.bfloat16)         # [2*c0, c1]
    w1 = jnp.concatenate([_pad2d(wl1, c1, c2), _pad2d(wr1, c1, c2)],
                         axis=0).astype(jnp.bfloat16)         # [2*c1, c2]
    b0p = _pad2d(b0.reshape(1, -1), 1, c1)                    # zero-padded hidden lanes
    b1p = _pad2d(b1.reshape(1, -1), 1, c2, value=-1e30)       # -1e30 on padded class lanes

    out = pl.pallas_call(
        sage_fused_kernel,
        out_shape=jax.ShapeDtypeStruct((m2_pad, c2), jnp.float32),
        in_specs=[
            _full_spec(a0.shape), _full_spec(a1.shape), _full_spec(xp.shape),
            _full_spec(w0.shape), _full_spec(b0p.shape),
            _full_spec(w1.shape), _full_spec(b1p.shape),
        ],
        out_specs=_full_spec((m2_pad, c2)),
    )(a0, a1, xp, w0, b0p, w1, b1p)

    return out[:nd1, :out_c]


# ---------------------------------------------------------------------------
# Pure-JAX reference (matches the PyTorch module in eval mode)
# ---------------------------------------------------------------------------

def sage_reference(x, adjs, params):
    h = x
    for i, ((e, _, (ns, nd)), (wl, wr, b)) in enumerate(zip(adjs, params)):
        src, dst = e[0], e[1]
        h_tgt = h[:nd]
        agg = jnp.zeros((nd, h.shape[1]), jnp.float32).at[dst].add(h[src])
        deg = jnp.zeros((nd,), jnp.float32).at[dst].add(1.0)
        agg = agg / jnp.maximum(deg, 1.0)[:, None]
        h = agg @ wl + h_tgt @ wr + b
        if i != len(params) - 1:
            h = jax.nn.relu(h)   # dropout p=0.5: eval-mode identity
    return jax.nn.log_softmax(h, axis=-1)


# ---------------------------------------------------------------------------
# Main
# ---------------------------------------------------------------------------

if __name__ == "__main__":
    key = jax.random.PRNGKey(0)

    # Small synthetic sizes consistent with the module.
    N = 16              # sampled source nodes at hop 0
    n1 = 8              # target nodes after hop 0
    n2 = 4              # target nodes after hop 1 (batch seeds)
    in_channels = 8
    hidden_channels = 32
    out_channels = 8
    num_edges0 = 48
    num_edges1 = 24

    keys = jax.random.split(key, 10)

    # Node features
    x = jax.random.normal(keys[0], (N, in_channels), dtype=jnp.float32)

    # Bipartite edge_index per hop: row 0 = source idx, row 1 = target idx
    e0_src = jax.random.randint(keys[1], (num_edges0,), 0, N)
    e0_dst = jax.random.randint(keys[2], (num_edges0,), 0, n1)
    e1_src = jax.random.randint(keys[3], (num_edges1,), 0, n1)
    e1_dst = jax.random.randint(keys[4], (num_edges1,), 0, n2)
    adjs = [
        (jnp.stack([e0_src, e0_dst]), None, (N, n1)),
        (jnp.stack([e1_src, e1_dst]), None, (n1, n2)),
    ]

    # SAGEConv params (lin_l with bias, lin_r without), stored pre-transposed [in, out].
    def init_layer(k, c_in, c_out):
        k1, k2, k3 = jax.random.split(k, 3)
        scale = 1.0 / jnp.sqrt(jnp.float32(c_in))
        Wl = jax.random.uniform(k1, (c_in, c_out), jnp.float32, -scale, scale)
        Wr = jax.random.uniform(k2, (c_in, c_out), jnp.float32, -scale, scale)
        bl = jax.random.uniform(k3, (c_out,), jnp.float32, -scale, scale)
        return Wl, Wr, bl

    params = [
        init_layer(keys[5], in_channels, hidden_channels),
        init_layer(keys[6], hidden_channels, out_channels),
    ]

    out = sage_forward(x, adjs, params)
    out = jax.block_until_ready(out)

    assert out.shape == (n2, out_channels), out.shape
    assert bool(jnp.all(jnp.isfinite(out))), out
    # log_softmax rows must exponentiate-sum to ~1
    row_sums = jnp.sum(jnp.exp(out), axis=-1)
    assert bool(jnp.all(jnp.abs(row_sums - 1.0) < 1e-3)), row_sums
    # Cross-check against a pure-JAX f32 reference (tolerance covers bf16 MXU operands).
    ref = sage_reference(x, adjs, params)
    max_err = float(jnp.max(jnp.abs(out - ref)))
    assert max_err < 0.1, max_err

    print("KERNEL_OK")
</pallas_src>

<mosaic_0001>
module attributes {stable_mosaic.version = 11 : i64} {
  func.func @sage_fused_kernel(%arg0: memref<128x128xbf16, #tpu.memory_space<vmem>>, %arg1: memref<16x128xbf16, #tpu.memory_space<vmem>>, %arg2: memref<128x128xbf16, #tpu.memory_space<vmem>>, %arg3: memref<256x128xbf16, #tpu.memory_space<vmem>>, %arg4: memref<1x128xf32, #tpu.memory_space<vmem>>, %arg5: memref<256x128xbf16, #tpu.memory_space<vmem>>, %arg6: memref<1x128xf32, #tpu.memory_space<vmem>>, %arg7: memref<16x128xf32, #tpu.memory_space<vmem>>) attributes {dimension_semantics = [], scalar_prefetch = 0 : i64, scratch_operands = 0 : i64, tpu.core_type = #tpu.core_type<tc>} {
    %c0 = arith.constant 0 : index
    %c0_0 = arith.constant 0 : index
    %0 = vector.load %arg2[%c0, %c0_0] : memref<128x128xbf16, #tpu.memory_space<vmem>>, vector<128x128xbf16>
    %c0_1 = arith.constant 0 : index
    %c0_2 = arith.constant 0 : index
    %1 = vector.load %arg0[%c0_1, %c0_2] : memref<128x128xbf16, #tpu.memory_space<vmem>>, vector<128x128xbf16>
    %cst = arith.constant dense<0.000000e+00> : vector<128x128xf32>
    %2 = tpu.matmul %1, %0, %cst {dimension_numbers = #tpu.dot_dimension_numbers<[1], [0], [0], [1], [0, 0, 1, 1], [], []>} : vector<128x128xbf16>, vector<128x128xbf16>, vector<128x128xf32> -> vector<128x128xf32>
    %3 = arith.truncf %2 : vector<128x128xf32> to vector<128x128xbf16>
    %4 = tpu.concatenate %3, %0 in 1 : vector<128x128xbf16>, vector<128x128xbf16> -> vector<128x256xbf16>
    %c0_3 = arith.constant 0 : index
    %c0_4 = arith.constant 0 : index
    %5 = vector.load %arg3[%c0_3, %c0_4] : memref<256x128xbf16, #tpu.memory_space<vmem>>, vector<256x128xbf16>
    %cst_5 = arith.constant dense<0.000000e+00> : vector<128x128xf32>
    %6 = tpu.matmul %4, %5, %cst_5 {dimension_numbers = #tpu.dot_dimension_numbers<[1], [0], [0], [1], [0, 0, 1, 1], [], []>} : vector<128x256xbf16>, vector<256x128xbf16>, vector<128x128xf32> -> vector<128x128xf32>
    %c0_6 = arith.constant 0 : index
    %c0_7 = arith.constant 0 : index
    %7 = vector.load %arg4[%c0_6, %c0_7] : memref<1x128xf32, #tpu.memory_space<vmem>>, vector<1x128xf32>
    %8 = vector.broadcast %7 : vector<1x128xf32> to vector<128x128xf32>
    %9 = arith.addf %6, %8 : vector<128x128xf32>
    %cst_8 = arith.constant 0.000000e+00 : f32
    %10 = vector.broadcast %cst_8 : f32 to vector<128x128xf32>
    %11 = arith.maximumf %9, %10 : vector<128x128xf32>
    %12 = arith.truncf %11 : vector<128x128xf32> to vector<128x128xbf16>
    %c0_9 = arith.constant 0 : index
    %c0_10 = arith.constant 0 : index
    %13 = vector.load %arg1[%c0_9, %c0_10] : memref<16x128xbf16, #tpu.memory_space<vmem>>, vector<16x128xbf16>
    %cst_11 = arith.constant dense<0.000000e+00> : vector<16x128xf32>
    %14 = tpu.matmul %13, %12, %cst_11 {dimension_numbers = #tpu.dot_dimension_numbers<[1], [0], [0], [1], [0, 0, 1, 1], [], []>} : vector<16x128xbf16>, vector<128x128xbf16>, vector<16x128xf32> -> vector<16x128xf32>
    %15 = arith.truncf %14 : vector<16x128xf32> to vector<16x128xbf16>
    %16 = vector.extract_strided_slice %12 {offsets = [0, 0], sizes = [16, 128], strides = [1, 1]} : vector<128x128xbf16> to vector<16x128xbf16>
    %17 = tpu.concatenate %15, %16 in 1 : vector<16x128xbf16>, vector<16x128xbf16> -> vector<16x256xbf16>
    %c0_12 = arith.constant 0 : index
    %c0_13 = arith.constant 0 : index
    %18 = vector.load %arg5[%c0_12, %c0_13] : memref<256x128xbf16, #tpu.memory_space<vmem>>, vector<256x128xbf16>
    %cst_14 = arith.constant dense<0.000000e+00> : vector<16x128xf32>
    %19 = tpu.matmul %17, %18, %cst_14 {dimension_numbers = #tpu.dot_dimension_numbers<[1], [0], [0], [1], [0, 0, 1, 1], [], []>} : vector<16x256xbf16>, vector<256x128xbf16>, vector<16x128xf32> -> vector<16x128xf32>
    %c0_15 = arith.constant 0 : index
    %c0_16 = arith.constant 0 : index
    %20 = vector.load %arg6[%c0_15, %c0_16] : memref<1x128xf32, #tpu.memory_space<vmem>>, vector<1x128xf32>
    %21 = vector.broadcast %20 : vector<1x128xf32> to vector<16x128xf32>
    %22 = arith.addf %19, %21 : vector<16x128xf32>
    %cst_17 = arith.constant dense<0xFF800000> : vector<16xf32>
    %23 = vector.multi_reduction <maximumf>, %22, %cst_17 [1] : vector<16x128xf32> to vector<16xf32>
    %24 = vector.shape_cast %23 : vector<16xf32> to vector<16x1xf32>
    %25 = vector.broadcast %24 : vector<16x1xf32> to vector<16x128xf32>
    %26 = arith.subf %22, %25 : vector<16x128xf32>
    %27 = math.exp %26 : vector<16x128xf32>
    %cst_18 = arith.constant dense<0.000000e+00> : vector<16xf32>
    %28 = vector.multi_reduction <add>, %27, %cst_18 [1] : vector<16x128xf32> to vector<16xf32>
    %29 = vector.shape_cast %28 : vector<16xf32> to vector<16x1xf32>
    %30 = math.log %29 : vector<16x1xf32>
    %31 = vector.broadcast %30 : vector<16x1xf32> to vector<16x128xf32>
    %32 = arith.subf %26, %31 : vector<16x128xf32>
    %c0_19 = arith.constant 0 : index
    %c0_20 = arith.constant 0 : index
    %33 = vector.load %arg7[%c0_19, %c0_20] : memref<16x128xf32, #tpu.memory_space<vmem>>, vector<16x128xf32>
    tpu.vector_store %arg7[%c0_19, %c0_20], %32 {strides = array<i32>} : memref<16x128xf32, #tpu.memory_space<vmem>>, vector<16x128xf32>,
    return
  }
}

</mosaic_0001>

<bundles_post_ra>
// kernel: tpu_custom_call.1
= control target key start
LH: loop header
LB: loop body
LE: loop exit
PB: predicated region body
PF: predicated region fallthrough
CT: control target
= control target key end

     0   :  { %12 = vsyncpa [#allocation3], 0  ;;  %s1500_s0 = inlined_call_operand.hbm [shape: bf16[128,128], index: 0, kind: input, shape index: {}]   ;;  %s1501_s1 = inlined_call_operand.hbm [shape: bf16[16,128], index: 1, kind: input, shape index: {}]   ;;  %s1502_s2 = inlined_call_operand.hbm [shape: bf16[128,128], index: 2, kind: input, shape index: {}]   ;;  %s1503_s3 = inlined_call_operand.hbm [shape: bf16[256,128], index: 3, kind: input, shape index: {}]   ;;  %s1504_s4 = inlined_call_operand.vmem [shape: f32[1,128], index: 4, kind: input, shape index: {}]   ;;  %s1505_s5 = inlined_call_operand.hbm [shape: bf16[256,128], index: 5, kind: input, shape index: {}]   ;;  %s1506_s6 = inlined_call_operand.vmem [shape: f32[1,128], index: 6, kind: input, shape index: {}]   ;;  %s1507_s7 = inlined_call_operand.hbm [shape: f32[16,128], index: 7, kind: output, shape index: {}]  }
   0x1   :  { %13 = vsyncpa [#allocation6], 0 }
   0x2   :  { %14 = vsyncpa [#allocation9], 0 }
   0x3   :  { %15 = vsyncpa [#allocation4], 0  ;;  %s1275_s24 = smov [#allocation5]   ;;  %s1276_s26 = smov [#allocation8]  }
   0x4   :  { %s33_s25 = sshll.u32 %s1275_s24, 4  ;;  %s57_s27 = sshll.u32 %s1276_s26, 4  ;;  %s34_s25 = int_to_ptr.vmem [resolvable:$true] %s33_s25  ;;  %s1327_s27 = int_to_ptr.vmem [resolvable:$true] %s57_s27 }
   0x5   :  { %s1135_s30 = scalar_lea.hbm %s1501_s1, 128 }
   0x6   :  { %p1136_p0 = scmp.ne.s32.totalorder %s1501_s1, %s1135_s30  ;;  %p1139_p1 = scmp.lt.u32.totalorder %s1135_s30, %s1501_s1 }
   0x8   :  { %p1141_p2 = pnand %p1139_p1, %p1136_p0 }
   0xa   :  { %1144 = shalt.err (!%p1141_p2)
}
   0xb   :  { %s1145_s12 = scalar_lea.vmem %s34_s25, 128  ;;  %p1150_p4 = scmp.lt.s32.totalorder %s34_s25, %s34_s25 }
   0xc   :  { %p1146_p3 = scmp.ne.s32.totalorder %s34_s25, %s1145_s12  ;;  %p1151_p5 = scmp.lt.s32.totalorder %s1145_s12, %s1145_s12 }
   0xe   :  { %p1152_p6 = por %p1151_p5, %p1150_p4 }
  0x10   :  { %p1153_p7 = pnand %p1152_p6, %p1146_p3 }
  0x12   :  { %1156 = shalt.err (!%p1153_p7)
}
  0x13   :  { %s1277_s13 = smov 64   ;;  %s1278_s14 = smov 4  }
  0x14   :  { %39 = dma.hbm_to_vmem [thread:$0]  %s1501_s1, 128, %s34_s25, [#allocation6], %s1277_s13, %s1277_s13, %s1278_s14  }
  0x15   :  { %s1157_s19 = scalar_lea.hbm %s1503_s3, 2048 }
  0x16   :  { %p1158_p8 = scmp.ne.s32.totalorder %s1503_s3, %s1157_s19  ;;  %p1161_p9 = scmp.lt.u32.totalorder %s1157_s19, %s1503_s3 }
  0x18   :  { %p1163_p10 = pnand %p1161_p9, %p1158_p8 }
  0x1a   :  { %1166 = shalt.err (!%p1163_p10)
}
  0x1b   :  { %s1167_s24 = scalar_lea.vmem %s1327_s27, 2048  ;;  %p1172_p12 = scmp.lt.s32.totalorder %s1327_s27, %s1327_s27 }
  0x1c   :  { %p1168_p11 = scmp.ne.s32.totalorder %s1327_s27, %s1167_s24  ;;  %p1173_p13 = scmp.lt.s32.totalorder %s1167_s24, %s1167_s24 }
  0x1e   :  { %p1174_p0 = por %p1173_p13, %p1172_p12 }
  0x20   :  { %p1175_p1 = pnand %p1174_p0, %p1168_p11 }
  0x22   :  { %1178 = shalt.err (!%p1175_p1)
}
  0x23   :  { %63 = dma.hbm_to_vmem [thread:$0]  %s1503_s3, 2048, %s1327_s27, [#allocation9], %s1277_s13, %s1277_s13, %s1278_s14  }
  0x24   :  { %s1279_s26 = smov [#allocation2]   ;;  %s1280_s29 = smov [#allocation7]  }
  0x25   :  { %s21_s28 = sshll.u32 %s1279_s26, 4  ;;  %s45_s30 = sshll.u32 %s1280_s29, 4  ;;  %s22_s28 = int_to_ptr.vmem [resolvable:$true] %s21_s28  ;;  %s1364_s30 = int_to_ptr.vmem [resolvable:$true] %s45_s30 }
  0x26   :  { %s1179_s10 = scalar_lea.hbm %s1500_s0, 1024 }
  0x27   :  { %p1180_p2 = scmp.ne.s32.totalorder %s1500_s0, %s1179_s10  ;;  %p1183_p3 = scmp.lt.u32.totalorder %s1179_s10, %s1500_s0 }
  0x29   :  { %p1185_p4 = pnand %p1183_p3, %p1180_p2 }
  0x2b   :  { %1188 = shalt.err (!%p1185_p4)
}
  0x2c   :  { %s1189_s3 = scalar_lea.vmem %s22_s28, 1024  ;;  %p1194_p6 = scmp.lt.s32.totalorder %s22_s28, %s22_s28 }
  0x2d   :  { %p1190_p5 = scmp.ne.s32.totalorder %s22_s28, %s1189_s3  ;;  %p1195_p7 = scmp.lt.s32.totalorder %s1189_s3, %s1189_s3 }
  0x2f   :  { %p1196_p8 = por %p1195_p7, %p1194_p6 }
  0x31   :  { %p1197_p9 = pnand %p1196_p8, %p1190_p5 }
  0x33   :  { %1200 = shalt.err (!%p1197_p9)
}
  0x34   :  { %27 = dma.hbm_to_vmem [thread:$0]  %s1500_s0, 1024, %s22_s28, [#allocation3], %s1277_s13, %s1277_s13, %s1278_s14  }
  0x35   :  { %s1201_s20 = scalar_lea.hbm %s1502_s2, 1024 }
  0x36   :  { %p1202_p10 = scmp.ne.s32.totalorder %s1502_s2, %s1201_s20  ;;  %p1205_p11 = scmp.lt.u32.totalorder %s1201_s20, %s1502_s2 }
  0x38   :  { %p1207_p12 = pnand %p1205_p11, %p1202_p10 }
  0x3a   :  { %1210 = shalt.err (!%p1207_p12)
}
  0x3b   :  { %s1211_s1 = scalar_lea.vmem %s1364_s30, 1024  ;;  %p1216_p0 = scmp.lt.s32.totalorder %s1364_s30, %s1364_s30 }
  0x3c   :  { %p1212_p13 = scmp.ne.s32.totalorder %s1364_s30, %s1211_s1  ;;  %p1217_p1 = scmp.lt.s32.totalorder %s1211_s1, %s1211_s1 }
  0x3e   :  { %p1218_p2 = por %p1217_p1, %p1216_p0 }
  0x40   :  { %p1219_p3 = pnand %p1218_p2, %p1212_p13 }
  0x42   :  { %1222 = shalt.err (!%p1219_p3)
}
  0x43   :  { %51 = dma.hbm_to_vmem [thread:$0]  %s1502_s2, 1024, %s1364_s30, [#allocation6], %s1277_s13, %s1277_s13, %s1278_s14  }
  0x44   :  { %s1281_s26 = smov [#allocation10]   ;;  %s1223_s9 = scalar_lea.hbm %s1505_s5, 2048 }
  0x45   :  { %s71_s28 = sshll.u32 %s1281_s26, 4  ;;  %p1224_p4 = scmp.ne.s32.totalorder %s1505_s5, %s1223_s9  ;;  %s72_s28 = int_to_ptr.vmem [resolvable:$true] %s71_s28 }
  0x46   :  { %p1227_p5 = scmp.lt.u32.totalorder %s1223_s9, %s1505_s5 }
  0x48   :  { %p1229_p6 = pnand %p1227_p5, %p1224_p4 }
  0x4a   :  { %1232 = shalt.err (!%p1229_p6)
}
  0x4b   :  { %s1233_s16 = scalar_lea.vmem %s72_s28, 2048  ;;  %p1238_p8 = scmp.lt.s32.totalorder %s72_s28, %s72_s28 }
  0x4c   :  { %p1234_p7 = scmp.ne.s32.totalorder %s72_s28, %s1233_s16  ;;  %p1239_p9 = scmp.lt.s32.totalorder %s1233_s16, %s1233_s16 }
  0x4e   :  { %p1240_p10 = por %p1239_p9, %p1238_p8 }
  0x50   :  { %p1241_p11 = pnand %p1240_p10, %p1234_p7 }
  0x52   :  { %1244 = shalt.err (!%p1241_p11)
}
  0x53   :  { %77 = dma.hbm_to_vmem [thread:$0]  %s1505_s5, 2048, %s72_s28, [#allocation9], %s1277_s13, %s1277_s13, %s1278_s14  }
  0x54   :  { %1267 = dma.done.wait [#allocation3], 1024  }
  0x55   :  { %1268 = vsyncadd [#allocation3], 4294966272 }
  0x56   :  { %1269 = dma.done.wait [#allocation6], 1152  }
  0x57   :  { %1270 = vsyncadd [#allocation6], 4294966144 }
  0x58   :  { %1271 = dma.done.wait [#allocation9], 4096  }
  0x59   :  { %1272 = vsyncadd [#allocation9], 4294963200  ;;  %v1078_v0 = vld [vmem:[#allocation7] sm:$0xff]   ;;  %v1416_v1 = vld [vmem:[#allocation7 + $0x8] sm:$0xff]   ;;  %v1282_v56 = vmov 0.0   ;;  %vm1283_vm0 = vmmov 0  }
  0x5a   :  { %1014 = vmatprep.subr.bf16.mxu0 %v1078_v0  ;;  %496 = vmatprep.mubr.bf16.mxu1 %v1078_v0  ;;  %v1419_v2 = vld [vmem:[#allocation7 + $0x10] sm:$0xff]   ;;  %v1422_v3 = vld [vmem:[#allocation7 + $0x18] sm:$0xff]   ;;  %v1427_v5 = vld [vmem:[#allocation7 + $0x20] sm:$0xff]  }
  0x5b   :  { %1015 = vmatpush3.bf16.msra.mxu0 %v1078_v0  ;;  %v1086_v4 = vld [vmem:[#allocation2] sm:$0xff]   ;;  %v1430_v6 = vld [vmem:[#allocation7 + $0x28] sm:$0xff]   ;;  %v1094_v7 = vld [vmem:[#allocation8 + $0x40] sm:$0xff]  }
  0x5c   :  { %1016 = vmatprep.subr.bf16.mxu0 %v1416_v1  ;;  %1030 = vmatprep.mubr.bf16.mxu0 %v1086_v4  ;;  %v1095_v8 = vld [vmem:[#allocation8] sm:$0xff]   ;;  %v1433_v9 = vld [vmem:[#allocation7 + $0x30] sm:$0xff]   ;;  %v1096_v10 = vld [vmem:[#allocation8 + $0x48] sm:$0xff]  }
  0x5d   :  { %919 = vmatprep.subr.bf16.mxu1 %v1094_v7  ;;  %v1097_v11 = vld [vmem:[#allocation8 + $0x8] sm:$0xff]   ;;  %v1098_v12 = vld [vmem:[#allocation8 + $0x50] sm:$0xff]   ;;  %v1437_v13 = vld [vmem:[#allocation7 + $0x38] sm:$0xff]  }
  0x5e   :  { %920 = vmatpush3.bf16.msra.mxu1 %v1095_v8  ;;  %v1099_v14 = vld [vmem:[#allocation8 + $0x10] sm:$0xff]   ;;  %v1100_v15 = vld [vmem:[#allocation8 + $0x58] sm:$0xff]   ;;  %v1087_v17 = vld [vmem:[#allocation2 + $0x8] sm:$0xff]  }
  0x5f   :  { %1017 = vmatpush3.bf16.msra.mxu0 %v1416_v1  ;;  %921 = vmatprep.subr.bf16.mxu1 %v1096_v10  ;;  %v1101_v16 = vld [vmem:[#allocation8 + $0x18] sm:$0xff]   ;;  %v1102_v18 = vld [vmem:[#allocation8 + $0x60] sm:$0xff]   ;;  %v1088_v19 = vld [vmem:[#allocation2 + $0x10] sm:$0xff]  }
  0x60   :  { %1018 = vmatprep.subr.bf16.mxu0 %v1419_v2  ;;  %v1103_v20 = vld [vmem:[#allocation8 + $0x20] sm:$0xff]   ;;  %v1104_v21 = vld [vmem:[#allocation8 + $0x68] sm:$0xff]   ;;  %v1106_v23 = vld [vmem:[#allocation8 + $0x70] sm:$0xff]  }
  0x61   :  { %v1105_v22 = vld [vmem:[#allocation8 + $0x28] sm:$0xff]   ;;  %v1089_v24 = vld [vmem:[#allocation2 + $0x18] sm:$0xff]   ;;  %v1090_v25 = vld [vmem:[#allocation2 + $0x20] sm:$0xff]  }
  0x62   :  { %922 = vmatpush3.bf16.msra.mxu1 %v1097_v11  ;;  %v1107_v26 = vld [vmem:[#allocation8 + $0x30] sm:$0xff]   ;;  %v1091_v27 = vld [vmem:[#allocation2 + $0x28] sm:$0xff]   ;;  %v1092_v28 = vld [vmem:[#allocation2 + $0x30] sm:$0xff]  }
  0x63   :  { %1019 = vmatpush3.bf16.msra.mxu0 %v1419_v2  ;;  %923 = vmatprep.subr.bf16.mxu1 %v1098_v12  ;;  %v1093_v29 = vld [vmem:[#allocation2 + $0x38] sm:$0xff]   ;;  %v1108_v30 = vld [vmem:[#allocation8 + $0x78] sm:$0xff]  }
  0x64   :  { %1020 = vmatprep.subr.bf16.mxu0 %v1422_v3  ;;  %v1109_v31 = vld [vmem:[#allocation8 + $0x38] sm:$0xff]  }
  0x65   :  { %v1456_v58 = vld [vmem:[%s1504_s4] ss:$0 sm:$0xff] }
  0x66   :  { %924 = vmatpush3.bf16.msra.mxu1 %v1099_v14 }
  0x67   :  { %1021 = vmatpush3.bf16.msra.mxu0 %v1422_v3  ;;  %925 = vmatprep.subr.bf16.mxu1 %v1100_v15 }
  0x68   :  { %1022 = vmatprep.subr.bf16.mxu0 %v1427_v5 }
  0x6a   :  { %926 = vmatpush3.bf16.msra.mxu1 %v1101_v16 }
  0x6b   :  { %1023 = vmatpush3.bf16.msra.mxu0 %v1427_v5  ;;  %927 = vmatprep.subr.bf16.mxu1 %v1102_v18 }
  0x6c   :  { %1024 = vmatprep.subr.bf16.mxu0 %v1430_v6 }
  0x6e   :  { %928 = vmatpush3.bf16.msra.mxu1 %v1103_v20 }
  0x6f   :  { %1025 = vmatpush3.bf16.msra.mxu0 %v1430_v6  ;;  %929 = vmatprep.subr.bf16.mxu1 %v1104_v21 }
  0x70   :  { %1026 = vmatprep.subr.bf16.mxu0 %v1433_v9 }
  0x72   :  { %930 = vmatpush3.bf16.msra.mxu1 %v1105_v22 }
  0x73   :  { %1027 = vmatpush3.bf16.msra.mxu0 %v1433_v9  ;;  %931 = vmatprep.subr.bf16.mxu1 %v1106_v23 }
  0x74   :  { %1028 = vmatprep.subr.bf16.mxu0 %v1437_v13 }
  0x76   :  { %932 = vmatpush3.bf16.msra.mxu1 %v1107_v26 }
  0x77   :  { %1029 = vmatpush3.bf16.msra.mxu0 %v1437_v13  ;;  %933 = vmatprep.subr.bf16.mxu1 %v1108_v30 }
  0x78   :  { %1046 = vmatprep.subr.bf16.mxu0 %v1282_v56 }
  0x7a   :  { %1031 = vmatmul.mubr.bf16.vlgmr.msra.gmra.mrb[0].mxu0 %v1087_v17  ;;  %934 = vmatpush3.bf16.msra.mxu1 %v1109_v31 }
  0x7b   :  { %1034 = vmatprep.mubr.bf16.mxu0 %v1088_v19 }
  0x82   :  { %1035 = vmatmul.mubr.bf16.gmra.mrb[4].mxu0 %v1089_v24 }
  0x83   :  { %1038 = vmatprep.mubr.bf16.mxu0 %v1090_v25 }
  0x8a   :  { %1039 = vmatmul.mubr.bf16.gmra.mrb[8].mxu0 %v1091_v27 }
  0x8b   :  { %1042 = vmatprep.mubr.bf16.mxu0 %v1092_v28 }
  0x92   :  { %1043 = vmatmul.mubr.bf16.gmra.mrb[12].mxu0 %v1093_v29 }
  0x93   :  { %1062 = vmatprep.mubr.msk.bf16.mxu0 %vm1283_vm0, %v1282_v56 }
 0x14d   :  { %v1032_v32 = vpop.f32.mrb[0].mxu0 }
 0x14e   :  { %v258_v33 = vpop.f32.mrb[1].mxu0 }
 0x14f   :  { %v1033_v34 = vpop.f32.mrb[2].mxu0 }
 0x150   :  { %v322_v35 = vpack.c.bf16 %v1033_v34, %v1032_v32  ;;  %v261_v36 = vpop.f32.mrb[3].mxu0 }
 0x151   :  { %v321_v37 = vpack.c.bf16 %v261_v36, %v258_v33 }
 0x153   :  { %497 = vmatmul.mubr.bf16.vlgmr.msra.gmra.mrb[0].mxu1 %v321_v37 }
 0x154   :  { %504 = vmatprep.mubr.bf16.mxu1 %v1416_v1 }
 0x155   :  { %v1036_v38 = vpop.f32.mrb[4].mxu0 }
 0x156   :  { %v274_v39 = vpop.f32.mrb[5].mxu0 }
 0x157   :  { %v1037_v40 = vpop.f32.mrb[6].mxu0 }
 0x158   :  { %v324_v41 = vpack.c.bf16 %v1037_v40, %v1036_v38  ;;  %v277_v42 = vpop.f32.mrb[7].mxu0 }
 0x159   :  { %v323_v43 = vpack.c.bf16 %v277_v42, %v274_v39 }
 0x15b   :  { %505 = vmatmul.mubr.bf16.gmra.mrb[4].mxu1 %v322_v35 }
 0x15c   :  { %512 = vmatprep.mubr.bf16.mxu1 %v1419_v2 }
 0x15d   :  { %v1040_v44 = vpop.f32.mrb[8].mxu0 }
 0x15e   :  { %v290_v45 = vpop.f32.mrb[9].mxu0 }
 0x15f   :  { %v1041_v46 = vpop.f32.mrb[10].mxu0 }
 0x160   :  { %v326_v47 = vpack.c.bf16 %v1041_v46, %v1040_v44  ;;  %v293_v48 = vpop.f32.mrb[11].mxu0 }
 0x161   :  { %v325_v49 = vpack.c.bf16 %v293_v48, %v290_v45 }
 0x163   :  { %513 = vmatmul.mubr.bf16.gmra.mrb[8].mxu1 %v323_v43 }
 0x164   :  { %520 = vmatprep.mubr.bf16.mxu1 %v1422_v3 }
 0x165   :  { %v1044_v50 = vpop.f32.mrb[12].mxu0 }
 0x166   :  { %v306_v51 = vpop.f32.mrb[13].mxu0 }
 0x167   :  { %v1045_v52 = vpop.f32.mrb[14].mxu0 }
 0x168   :  { %v328_v53 = vpack.c.bf16 %v1045_v52, %v1044_v50  ;;  %v309_v54 = vpop.f32.mrb[15].mxu0 }
 0x169   :  { %v327_v55 = vpack.c.bf16 %v309_v54, %v306_v51 }
 0x16b   :  { %521 = vmatmul.mubr.bf16.gmra.mrb[12].mxu1 %v324_v41 }
 0x16c   :  { %528 = vmatprep.mubr.bf16.mxu1 %v1427_v5 }
 0x173   :  { %529 = vmatmul.mubr.bf16.gmra.mrb[16].mxu1 %v325_v49 }
 0x174   :  { %536 = vmatprep.mubr.bf16.mxu1 %v1430_v6 }
 0x17b   :  { %537 = vmatmul.mubr.bf16.gmra.mrb[20].mxu1 %v326_v47 }
 0x17c   :  { %544 = vmatprep.mubr.bf16.mxu1 %v1433_v9 }
 0x183   :  { %545 = vmatmul.mubr.bf16.gmra.mrb[24].mxu1 %v327_v55 }
 0x184   :  { %552 = vmatprep.mubr.bf16.mxu1 %v1437_v13 }
 0x18b   :  { %553 = vmatmul.mubr.bf16.gmra.mrb[28].mxu1 %v328_v53 }
 0x226   :  { %v935_v57 = vpop.f32.mrb[0].mxu1 }
 0x227   :  { %v936_v59 = vpop.f32.mrb[1].mxu1 }
 0x228   :  { %v937_v60 = vadd.f32 %v936_v59, %v935_v57  ;;  %v938_v61 = vpop.f32.mrb[2].mxu1 }
 0x229   :  { %v939_v62 = vpop.f32.mrb[3].mxu1 }
 0x22a   :  { %v499_v63 = vadd.f32 %v937_v60, %v1456_v58  ;;  %v940_v0 = vadd.f32 %v939_v62, %v938_v61 }
 0x22c   :  { %v502_v1 = vadd.f32 %v940_v0, %v1456_v58  ;;  %v561_v2 = vmax.f32 %v499_v63, 0.0 }
 0x22e   :  { %v562_v3 = vmax.f32 %v502_v1, 0.0  ;;  %v941_v4 = vpop.f32.mrb[4].mxu1 }
 0x22f   :  { %v942_v5 = vpop.f32.mrb[5].mxu1 }
 0x230   :  { %v1460_v6 = vpack.c.bf16 %v562_v3, %v561_v2  ;;  %v943_v7 = vadd.f32 %v942_v5, %v941_v4  ;;  %v944_v8 = vpop.f32.mrb[6].mxu1 }
 0x231   :  { %v945_v9 = vpop.f32.mrb[7].mxu1 }
 0x232   :  { %v507_v10 = vadd.f32 %v943_v7, %v1456_v58  ;;  %v946_v11 = vadd.f32 %v945_v9, %v944_v8  ;;  %1047 = vmatpush3.bf16.msra.mxu0 %v1460_v6 }
 0x233   :  { %1048 = vmatprep.subr.bf16.mxu0 %v1282_v56 }
 0x234   :  { %v510_v12 = vadd.f32 %v946_v11, %v1456_v58  ;;  %v563_v13 = vmax.f32 %v507_v10, 0.0 }
 0x236   :  { %v564_v14 = vmax.f32 %v510_v12, 0.0  ;;  %v947_v15 = vpop.f32.mrb[8].mxu1 }
 0x237   :  { %v948_v16 = vpop.f32.mrb[9].mxu1 }
 0x238   :  { %v578_v17 = vpack.c.bf16 %v564_v14, %v563_v13  ;;  %v949_v18 = vadd.f32 %v948_v16, %v947_v15  ;;  %v950_v19 = vpop.f32.mrb[10].mxu1 }
 0x239   :  { %v951_v20 = vpop.f32.mrb[11].mxu1 }
 0x23a   :  { %v515_v21 = vadd.f32 %v949_v18, %v1456_v58  ;;  %v952_v22 = vadd.f32 %v951_v20, %v950_v19  ;;  %1049 = vmatpush3.bf16.msra.mxu0 %v578_v17  ;;  %v1111_v20 = vld [vmem:[#allocation10 + $0x40] sm:$0xff]  }
 0x23b   :  { %1050 = vmatprep.subr.bf16.mxu0 %v1282_v56 }
 0x23c   :  { %v518_v23 = vadd.f32 %v952_v22, %v1456_v58  ;;  %v565_v24 = vmax.f32 %v515_v21, 0.0  ;;  %v1110_v22 = vld [vmem:[#allocation5] sm:$0xff]  }
 0x23e   :  { %v566_v25 = vmax.f32 %v518_v23, 0.0  ;;  %v953_v26 = vpop.f32.mrb[12].mxu1  ;;  %v1112_v23 = vld [vmem:[#allocation10] sm:$0xff]  }
 0x23f   :  { %v954_v27 = vpop.f32.mrb[13].mxu1 }
 0x240   :  { %v579_v28 = vpack.c.bf16 %v566_v25, %v565_v24  ;;  %v955_v29 = vadd.f32 %v954_v27, %v953_v26  ;;  %v956_v30 = vpop.f32.mrb[14].mxu1  ;;  %v1113_v24 = vld [vmem:[#allocation10 + $0x48] sm:$0xff]   ;;  %v1115_v26 = vld [vmem:[#allocation10 + $0x50] sm:$0xff]   ;;  %v1118_v27 = vld [vmem:[#allocation10 + $0x18] sm:$0xff]  }
 0x241   :  { %v957_v31 = vpop.f32.mrb[15].mxu1  ;;  %v1114_v25 = vld [vmem:[#allocation10 + $0x8] sm:$0xff]  }
 0x242   :  { %v523_v32 = vadd.f32 %v955_v29, %v1456_v58  ;;  %v958_v33 = vadd.f32 %v957_v31, %v956_v30  ;;  %1051 = vmatpush3.bf16.msra.mxu0 %v579_v28  ;;  %v1119_v28 = vld [vmem:[#allocation10 + $0x60] sm:$0xff]   ;;  %v1121_v30 = vld [vmem:[#allocation10 + $0x68] sm:$0xff]  }
 0x243   :  { %1052 = vmatprep.subr.bf16.mxu0 %v1282_v56  ;;  %v1120_v29 = vld [vmem:[#allocation10 + $0x20] sm:$0xff]   ;;  %v1122_v31 = vld [vmem:[#allocation10 + $0x28] sm:$0xff]  }
 0x244   :  { %v526_v34 = vadd.f32 %v958_v33, %v1456_v58  ;;  %v567_v35 = vmax.f32 %v523_v32, 0.0  ;;  %v1124_v32 = vld [vmem:[#allocation10 + $0x30] sm:$0xff]   ;;  %v1125_v33 = vld [vmem:[#allocation10 + $0x78] sm:$0xff]  }
 0x246   :  { %v568_v36 = vmax.f32 %v526_v34, 0.0  ;;  %v959_v37 = vpop.f32.mrb[16].mxu1  ;;  %v1126_v34 = vld [vmem:[#allocation10 + $0x38] sm:$0xff]  }
 0x247   :  { %v960_v38 = vpop.f32.mrb[17].mxu1 }
 0x248   :  { %v580_v39 = vpack.c.bf16 %v568_v36, %v567_v35  ;;  %v961_v40 = vadd.f32 %v960_v38, %v959_v37  ;;  %v962_v41 = vpop.f32.mrb[18].mxu1 }
 0x249   :  { %v963_v42 = vpop.f32.mrb[19].mxu1 }
 0x24a   :  { %v531_v43 = vadd.f32 %v961_v40, %v1456_v58  ;;  %v964_v44 = vadd.f32 %v963_v42, %v962_v41  ;;  %1053 = vmatpush3.bf16.msra.mxu0 %v580_v39  ;;  %v886_v42 = vld [vmem:[%s1506_s6] ss:$0 sm:$0xff]  ;;  %s1284_s6 = smov [#allocation11]  }
 0x24b   :  { %1054 = vmatprep.subr.bf16.mxu0 %v1282_v56  ;;  %s838_s3 = sshll.u32 %s1284_s6, 4  ;;  %s839_s3 = int_to_ptr.vmem [resolvable:$true] %s838_s3 }
 0x24c   :  { %v534_v45 = vadd.f32 %v964_v44, %v1456_v58  ;;  %v569_v46 = vmax.f32 %v531_v43, 0.0  ;;  %s1245_s27 = scalar_lea.vmem %s839_s3, 256  ;;  %p1250_p13 = scmp.lt.s32.totalorder %s839_s3, %s839_s3 }
 0x24d   :  { %p1246_p12 = scmp.ne.s32.totalorder %s839_s3, %s1245_s27  ;;  %p1251_p0 = scmp.lt.s32.totalorder %s1245_s27, %s1245_s27 }
 0x24e   :  { %v570_v47 = vmax.f32 %v534_v45, 0.0  ;;  %v965_v48 = vpop.f32.mrb[20].mxu1 }
 0x24f   :  { %v966_v49 = vpop.f32.mrb[21].mxu1  ;;  %p1252_p1 = por %p1251_p0, %p1250_p13 }
 0x250   :  { %v581_v50 = vpack.c.bf16 %v570_v47, %v569_v46  ;;  %v967_v51 = vadd.f32 %v966_v49, %v965_v48  ;;  %v968_v52 = vpop.f32.mrb[22].mxu1 }
 0x251   :  { %v969_v53 = vpop.f32.mrb[23].mxu1  ;;  %p1253_p2 = pnand %p1252_p1, %p1246_p12 }
 0x252   :  { %v539_v54 = vadd.f32 %v967_v51, %v1456_v58  ;;  %v970_v55 = vadd.f32 %v969_v53, %v968_v52  ;;  %1055 = vmatpush3.bf16.msra.mxu0 %v581_v50 }
 0x253   :  { %1056 = vmatprep.subr.bf16.mxu0 %v1282_v56 }
 0x254   :  { %v542_v57 = vadd.f32 %v970_v55, %v1456_v58  ;;  %v571_v59 = vmax.f32 %v539_v54, 0.0 }
 0x256   :  { %v572_v60 = vmax.f32 %v542_v57, 0.0  ;;  %v971_v61 = vpop.f32.mrb[24].mxu1 }
 0x257   :  { %v972_v62 = vpop.f32.mrb[25].mxu1 }
 0x258   :  { %v582_v63 = vpack.c.bf16 %v572_v60, %v571_v59  ;;  %v973_v0 = vadd.f32 %v972_v62, %v971_v61  ;;  %v974_v1 = vpop.f32.mrb[26].mxu1 }
 0x259   :  { %v975_v2 = vpop.f32.mrb[27].mxu1 }
 0x25a   :  { %v547_v3 = vadd.f32 %v973_v0, %v1456_v58  ;;  %v976_v4 = vadd.f32 %v975_v2, %v974_v1  ;;  %1057 = vmatpush3.bf16.msra.mxu0 %v582_v63 }
 0x25b   :  { %1058 = vmatprep.subr.bf16.mxu0 %v1282_v56 }
 0x25c   :  { %v550_v5 = vadd.f32 %v976_v4, %v1456_v58  ;;  %v573_v7 = vmax.f32 %v547_v3, 0.0 }
 0x25e   :  { %v574_v8 = vmax.f32 %v550_v5, 0.0  ;;  %v977_v9 = vpop.f32.mrb[28].mxu1 }
 0x25f   :  { %v978_v10 = vpop.f32.mrb[29].mxu1 }
 0x260   :  { %v583_v11 = vpack.c.bf16 %v574_v8, %v573_v7  ;;  %v979_v12 = vadd.f32 %v978_v10, %v977_v9  ;;  %v980_v13 = vpop.f32.mrb[30].mxu1 }
 0x261   :  { %v981_v14 = vpop.f32.mrb[31].mxu1 }
 0x262   :  { %v555_v15 = vadd.f32 %v979_v12, %v1456_v58  ;;  %v982_v16 = vadd.f32 %v981_v14, %v980_v13  ;;  %1059 = vmatpush3.bf16.msra.mxu0 %v583_v11 }
 0x263   :  { %1060 = vmatprep.subr.bf16.mxu0 %v1282_v56  ;;  %v1116_v56 = vld [vmem:[#allocation10 + $0x10] sm:$0xff]  }
 0x264   :  { %v558_v17 = vadd.f32 %v982_v16, %v1456_v58  ;;  %v575_v18 = vmax.f32 %v555_v15, 0.0  ;;  %v1117_v58 = vld [vmem:[#allocation10 + $0x58] sm:$0xff]  }
 0x266   :  { %v576_v19 = vmax.f32 %v558_v17, 0.0 }
 0x268   :  { %v584_v21 = vpack.c.bf16 %v576_v19, %v575_v18 }
 0x26a   :  { %1061 = vmatpush3.bf16.msra.mxu0 %v584_v21 }
 0x26b   :  { %992 = vmatprep.subr.bf16.mxu0 %v1111_v20 }
 0x26d   :  { %1063 = vmatmul.mubr.bf16.vlgmr.msra.gmra.mrb[16].mxu0 %v1110_v22 }
 0x26e   :  { %802 = vmatprep.mubr.bf16.mxu0 %v1460_v6  ;;  %993 = vmatpush3.bf16.msra.mxu0 %v1112_v23  ;;  %v1123_v6 = vld [vmem:[#allocation10 + $0x70] sm:$0xff]  }
 0x26f   :  { %994 = vmatprep.subr.bf16.mxu0 %v1113_v24 }
 0x272   :  { %995 = vmatpush3.bf16.msra.mxu0 %v1114_v25 }
 0x273   :  { %996 = vmatprep.subr.bf16.mxu0 %v1115_v26 }
 0x276   :  { %997 = vmatpush3.bf16.msra.mxu0 %v1116_v56 }
 0x277   :  { %998 = vmatprep.subr.bf16.mxu0 %v1117_v58 }
 0x27a   :  { %999 = vmatpush3.bf16.msra.mxu0 %v1118_v27 }
 0x27b   :  { %1000 = vmatprep.subr.bf16.mxu0 %v1119_v28 }
 0x27e   :  { %1001 = vmatpush3.bf16.msra.mxu0 %v1120_v29 }
 0x27f   :  { %1002 = vmatprep.subr.bf16.mxu0 %v1121_v30 }
 0x282   :  { %1003 = vmatpush3.bf16.msra.mxu0 %v1122_v31 }
 0x283   :  { %1004 = vmatprep.subr.bf16.mxu0 %v1123_v6 }
 0x286   :  { %1005 = vmatpush3.bf16.msra.mxu0 %v1124_v32 }
 0x287   :  { %1006 = vmatprep.subr.bf16.mxu0 %v1125_v33 }
 0x28a   :  { %1007 = vmatpush3.bf16.msra.mxu0 %v1126_v34 }
 0x340   :  { %v627_v35 = vpop.f32.mrb[16].mxu0 }
 0x341   :  { %v1064_v36 = vpop.f32.mrb[17].mxu0 }
 0x342   :  { %v630_v37 = vpop.f32.mrb[18].mxu0 }
 0x343   :  { %v634_v38 = vpack.c.bf16 %v630_v37, %v627_v35  ;;  %v1065_v39 = vpop.f32.mrb[19].mxu0 }
 0x345   :  { %803 = vmatmul.mubr.bf16.vlgmr.msra.gmra.mrb[20].mxu0 %v634_v38 }
 0x418   :  { %v1008_v40 = vpop.f32.mrb[20].mxu0 }
 0x419   :  { %v1009_v41 = vpop.f32.mrb[21].mxu0 }
 0x41a   :  { %v1010_v43 = vadd.f32 %v1009_v41, %v1008_v40  ;;  %v1011_v44 = vpop.f32.mrb[22].mxu0 }
 0x41b   :  { %v1012_v45 = vpop.f32.mrb[23].mxu0 }
 0x41c   :  { %v1013_v46 = vadd.f32 %v1012_v45, %v1011_v44  ;;  %v805_v47 = vadd.f32 %v1010_v43, %v886_v42 }
 0x41e   :  { %811 = vmax.xlane.f32.xlu0 %v805_v47  ;;  %v808_v48 = vadd.f32 %v1013_v46, %v886_v42 }
 0x422   :  { %813 = vmax.xlane.f32.xlu0 %v808_v48 }
 0x4ab   :  { %v812_v49 = vpop.xlane.xlu0 %811 }
 0x4ac   :  { %v815_v50 = vsub.f32 %v805_v47, %v812_v49 }
 0x4ae   :  { %v817_v51 = vmul.f32 1.442695, %v815_v50 }
 0x4af   :  { %v814_v52 = vpop.xlane.xlu0 %813 }
 0x4b0   :  { %v816_v53 = vsub.f32 %v808_v48, %v814_v52  ;;  %1127 = vpow2.f32 %v817_v51 }
 0x4b2   :  { %v819_v54 = vmul.f32 1.442695, %v816_v53 }
 0x4b4   :  { %1129 = vpow2.f32 %v819_v54 }
 0x4ba   :  { %v1128_v55 = vpop.eup %1127 }
 0x4bb   :  { %821 = vadd.xlane.f32.xlu1 %v1128_v55 }
 0x4be   :  { %v1130_v57 = vpop.eup %1129 }
 0x4bf   :  { %823 = vadd.xlane.f32.xlu1 %v1130_v57 }
 0x548   :  { %v822_v59 = vpop.xlane.xlu1 %821 }
 0x549   :  { %1131 = vlog2.f32 %v822_v59 }
 0x54c   :  { %v824_v60 = vpop.xlane.xlu1 %823 }
 0x54d   :  { %1133 = vlog2.f32 %v824_v60 }
 0x553   :  { %v1132_v61 = vpop.eup %1131 }
 0x554   :  { %v826_v62 = vmul.f32 0.6931472, %v1132_v61 }
 0x556   :  { %v829_v63 = vsub.f32 %v815_v50, %v826_v62 }
 0x557   :  { %v1134_v0 = vpop.eup %1133 }
 0x558   :  { %831 = vst [vmem:[#allocation11] sm:$0xff] %v829_v63  ;;  %v828_v1 = vmul.f32 0.6931472, %v1134_v0 }
 0x55a   :  { %v830_v2 = vsub.f32 %v816_v53, %v828_v1 }
 0x55c   :  { %832 = vst [vmem:[#allocation11 + $0x8] sm:$0xff] %v830_v2 }
 0x55d   :  { %1256 = shalt.err (!%p1253_p2)
}
 0x55e   :  { %s1257_s19 = scalar_lea.hbm %s1507_s7, 256 }
 0x55f   :  { %p1258_p3 = scmp.ne.s32.totalorder %s1507_s7, %s1257_s19  ;;  %p1261_p4 = scmp.lt.u32.totalorder %s1257_s19, %s1507_s7 }
 0x561   :  { %p1263_p5 = pnand %p1261_p4, %p1258_p3 }
 0x563   :  { %1266 = shalt.err (!%p1263_p5)
}
 0x564   :  { %s1285_s24 = smov 128   ;;  %s1286_s1 = smov 8  }
 0x565   :  { %844 = dma.vmem_to_hbm [thread:$0]  %s839_s3, 256, %s1507_s7, [#allocation4], %s1285_s24, %s1285_s24, %s1286_s1  }
 0x566   :  { %1273 = dma.done.wait [#allocation4], 256  }
 0x567   :  { %1274 = vsyncadd [#allocation4], 4294967040 }
 0x568   :  { %848 = vsyncpa [#allocation3], 1 }
 0x569   :  { %849 = vsyncpa [#allocation6], 1 }
 0x56a   :  { %850 = vsyncpa [#allocation9], 1 }
 0x56b   :  { %851 = vsyncpa [#allocation4], 1 }

</bundles_post_ra>
